<compile_context>
chip_gen: v6e
topology: v6e:2x2x1
jax: 0.10.0
libtpu: 0.0.40
codegen_flags: <defaults>
</compile_context>

<pallas_src>
import functools

import jax
import jax.numpy as jnp
from jax.experimental import pallas as pl
from jax.experimental.pallas import tpu as pltpu

_LANE = 128


def _round_up(v, m):
    return ((v + m - 1) // m) * m


def _timm_fwd_kernel(patches_ref, wc_ref, bc_ref, wh_ref, bh_ref, out_ref,
                     acc_ref, *, inv_hw):
    # patches_ref: (1, THW, K)          im2col rows for image i, row-tile j (bf16)
    # wc_ref:      (K, C_mid_pad)       conv weight as matmul (bf16)
    # bc_ref:      (1, C_mid_pad)       conv bias (f32)
    # wh_ref:      (C_mid_pad, NC_pad)  classifier weight (f32, resident/tiny)
    # bh_ref:      (1, NC_pad)          classifier bias (f32)
    # out_ref:     (1, 1, NC_pad)       logits row for image i (f32)
    # acc_ref:     (1, C_mid_pad)       running pooled sum (f32 scratch)
    j = pl.program_id(1)

    @pl.when(j == 0)
    def _init():
        acc_ref[...] = jnp.zeros_like(acc_ref)

    # Conv stem tile: bf16 MXU matmul with f32 accumulation, + bias + ReLU,
    # then partial pooled sum in f32.
    p = patches_ref[0]                                        # (THW, K) bf16
    feat = jnp.dot(p, wc_ref[...], preferred_element_type=jnp.float32)
    feat = jnp.maximum(feat + bc_ref[...], 0.0)               # (THW, C_mid_pad) f32
    acc_ref[...] += jnp.sum(feat, axis=0, keepdims=True)      # (1, C_mid_pad)

    @pl.when(j == pl.num_programs(1) - 1)
    def _finalize():
        pooled = acc_ref[...] * inv_hw                        # mean over H*W (f32)
        logits = jnp.dot(pooled, wh_ref[...],
                         preferred_element_type=jnp.float32) + bh_ref[...]
        out_ref[...] = logits[None].astype(out_ref.dtype)     # (1, 1, NC_pad)


def timm_model_forward(x_nchw, conv_w, conv_b, head_w, head_b, *,
                       block_rows=None):
    """x_nchw: (N, C_in, H, W) f32. Returns logits (N, num_classes) f32."""
    n, c_in, h, w = x_nchw.shape
    kk = 3
    c_mid = conv_w.shape[0]
    num_classes = head_w.shape[0]
    hw = h * w

    k_raw = kk * kk * c_in                    # K stays un-padded in HBM
    c_mid_pad = _round_up(c_mid, _LANE)
    ncls_pad = _round_up(num_classes, _LANE)

    # --- glue: NCHW -> NHWC (bf16), pad, im2col (3x3, stride 1, pad 1) ---
    x_nhwc = jnp.transpose(x_nchw, (0, 2, 3, 1)).astype(jnp.bfloat16)
    x_sp = jnp.pad(x_nhwc, ((0, 0), (1, 1), (1, 1), (0, 0)))
    taps = [x_sp[:, dy:dy + h, dx:dx + w, :]
            for dy in range(kk) for dx in range(kk)]
    patches = jnp.concatenate(taps, axis=-1).reshape(n, hw, k_raw)  # bf16

    # Conv weight (C_mid, C_in, 3, 3) -> (3,3,C_in,C_mid) -> (K, C_mid_pad) bf16.
    wc = jnp.transpose(conv_w, (2, 3, 1, 0)).reshape(k_raw, c_mid)
    wc = jnp.pad(wc, ((0, 0), (0, c_mid_pad - c_mid))).astype(jnp.bfloat16)
    bc = jnp.pad(conv_b, (0, c_mid_pad - c_mid)).reshape(1, c_mid_pad)
    bc = bc.astype(jnp.float32)
    # Head stays f32: it is tiny (128x128) and resident for the whole grid.
    wh = jnp.pad(head_w.T, ((0, c_mid_pad - c_mid),
                            (0, ncls_pad - num_classes))).astype(jnp.float32)
    bh = jnp.pad(head_b, (0, ncls_pad - num_classes)).reshape(1, ncls_pad)
    bh = bh.astype(jnp.float32)

    # Row-tile size: multiple of 8 sublanes, divides H*W exactly (no masking
    # needed for the pooled sum).  Largest candidate keeps double-buffered
    # inputs well under every generation's scoped-VMEM budget:
    # 2048 rows x 36 x bf16 = 144 KiB per buffer.
    if block_rows is None:
        block_rows = hw
        for cand in (2048, 1024, 512, 256, 128, 64, 32, 16, 8):
            if hw % cand == 0:
                block_rows = cand
                break
    assert hw % block_rows == 0, (hw, block_rows)
    n_row_tiles = hw // block_rows

    kernel = functools.partial(_timm_fwd_kernel, inv_hw=1.0 / float(hw))

    flops = 2 * n * hw * k_raw * c_mid_pad + 2 * n * c_mid_pad * ncls_pad
    bytes_accessed = (2 * patches.size + 2 * wc.size + 4 * bc.size +
                      4 * wh.size + 4 * bh.size + 4 * n * ncls_pad)

    out = pl.pallas_call(
        kernel,
        out_shape=jax.ShapeDtypeStruct((n, 1, ncls_pad), jnp.float32),
        grid=(n, n_row_tiles),
        in_specs=[
            # Last block dim equals the full array dim (36) -> legal, un-padded.
            pl.BlockSpec((1, block_rows, k_raw), lambda i, j: (i, j, 0)),
            pl.BlockSpec((k_raw, c_mid_pad), lambda i, j: (0, 0)),
            pl.BlockSpec((1, c_mid_pad), lambda i, j: (0, 0)),
            pl.BlockSpec((c_mid_pad, ncls_pad), lambda i, j: (0, 0)),
            pl.BlockSpec((1, ncls_pad), lambda i, j: (0, 0)),
        ],
        out_specs=pl.BlockSpec((1, 1, ncls_pad), lambda i, j: (i, 0, 0)),
        scratch_shapes=[pltpu.VMEM((1, c_mid_pad), jnp.float32)],
        compiler_params=pltpu.CompilerParams(
            dimension_semantics=("parallel", "arbitrary"),
            vmem_limit_bytes=32 * 1024 * 1024),
        cost_estimate=pl.CostEstimate(
            flops=int(flops), transcendentals=0,
            bytes_accessed=int(bytes_accessed)),
    )(patches, wc, bc, wh, bh)

    return out.reshape(n, ncls_pad)[:, :num_classes]


def _reference(x_nchw, conv_w, conv_b, head_w, head_b):
    # Pure-JAX reference mirroring the kernel's bf16 rounding of the conv
    # inputs (products are exact in bf16 MXU with f32 accumulation, so the
    # remaining differences are accumulation-order level).
    xb = x_nchw.astype(jnp.bfloat16).astype(jnp.float32)
    wb = conv_w.astype(jnp.bfloat16).astype(jnp.float32)
    y = jax.lax.conv_general_dilated(
        xb, wb, window_strides=(1, 1), padding="SAME",
        dimension_numbers=("NCHW", "OIHW", "NCHW"))
    y = y + conv_b[None, :, None, None]
    y = jnp.maximum(y, 0.0)
    pooled = jnp.mean(y, axis=(2, 3))                        # (N, C_mid)
    return pooled @ head_w.T + head_b


if __name__ == "__main__":
    # Small shapes consistent with an image classifier: batch=2, in_chans=4,
    # spatial=16x16, mid channels=32, num_classes=10.
    N, C_IN, H, W = 2, 4, 16, 16
    C_MID, NUM_CLASSES = 32, 10

    key = jax.random.PRNGKey(0)
    kx, kw1, kb1, kw2, kb2 = jax.random.split(key, 5)

    x = jax.random.normal(kx, (N, C_IN, H, W), dtype=jnp.float32)
    conv_w = 0.1 * jax.random.normal(kw1, (C_MID, C_IN, 3, 3), dtype=jnp.float32)
    conv_b = 0.1 * jax.random.normal(kb1, (C_MID,), dtype=jnp.float32)
    head_w = 0.1 * jax.random.normal(kw2, (NUM_CLASSES, C_MID), dtype=jnp.float32)
    head_b = 0.1 * jax.random.normal(kb2, (NUM_CLASSES,), dtype=jnp.float32)

    # block_rows=64 -> 4 row-tiles per image: exercises the pl.when
    # init / accumulate / finalize path of the pooled-sum accumulator.
    out = timm_model_forward(x, conv_w, conv_b, head_w, head_b, block_rows=64)
    out = jax.block_until_ready(out)

    ref = _reference(x, conv_w, conv_b, head_w, head_b)
    assert out.shape == (N, NUM_CLASSES), out.shape
    # Tolerance accounts for bf16 activation/weight rounding and TPU default
    # matmul precision in the reference; algorithmic bugs would be O(0.1+).
    assert jnp.allclose(out, ref, atol=1e-2, rtol=1e-2), (
        float(jnp.max(jnp.abs(out - ref))))

    print("KERNEL_OK")
</pallas_src>

<mosaic_0001>
module attributes {stable_mosaic.version = 11 : i64} {
  func.func @_timm_fwd_kernel(%arg0: i32, %arg1: i32, %arg2: memref<1x64x36xbf16, #tpu.memory_space<vmem>>, %arg3: memref<36x128xbf16, #tpu.memory_space<vmem>>, %arg4: memref<1x128xf32, #tpu.memory_space<vmem>>, %arg5: memref<128x128xf32, #tpu.memory_space<vmem>>, %arg6: memref<1x128xf32, #tpu.memory_space<vmem>>, %arg7: memref<1x1x128xf32, #tpu.memory_space<vmem>>, %arg8: memref<1x128xf32, #tpu.memory_space<vmem>>) attributes {dimension_semantics = [#tpu.dimension_semantics<parallel>, #tpu.dimension_semantics<arbitrary>], iteration_bounds = array<i64: 2, 4>, scalar_prefetch = 0 : i64, scratch_operands = 1 : i64, tpu.core_type = #tpu.core_type<tc>, window_params = [{transform_indices = @transform_0, window_bounds = array<i64: 1, 64, 36>}, {pipeline_mode = #tpu.pipeline_mode<synchronous>, transform_indices = @transform_1, window_bounds = array<i64: 36, 128>}, {pipeline_mode = #tpu.pipeline_mode<synchronous>, transform_indices = @transform_2, window_bounds = array<i64: 1, 128>}, {pipeline_mode = #tpu.pipeline_mode<synchronous>, transform_indices = @transform_3, window_bounds = array<i64: 128, 128>}, {pipeline_mode = #tpu.pipeline_mode<synchronous>, transform_indices = @transform_4, window_bounds = array<i64: 1, 128>}, {transform_indices = @transform_5, window_bounds = array<i64: 1, 1, 128>}]} {
    %c0_i32 = arith.constant 0 : i32
    %0 = arith.cmpi eq, %arg1, %c0_i32 : i32
    %1 = arith.extui %0 : i1 to i32
    %c0_i32_0 = arith.constant 0 : i32
    %2 = arith.cmpi ne, %1, %c0_i32_0 : i32
    scf.if %2 {
      %cst_14 = arith.constant 0.000000e+00 : f32
      %20 = vector.broadcast %cst_14 : f32 to vector<1x128xf32>
      %c0_15 = arith.constant 0 : index
      %c0_16 = arith.constant 0 : index
      %21 = vector.load %arg8[%c0_15, %c0_16] : memref<1x128xf32, #tpu.memory_space<vmem>>, vector<1x128xf32>
      tpu.vector_store %arg8[%c0_15, %c0_16], %20 {strides = array<i32>} : memref<1x128xf32, #tpu.memory_space<vmem>>, vector<1x128xf32>,
    } else {
    }
    %c0 = arith.constant 0 : index
    %c0_1 = arith.constant 0 : index
    %c0_2 = arith.constant 0 : index
    %3 = vector.load %arg2[%c0, %c0_1, %c0_2] : memref<1x64x36xbf16, #tpu.memory_space<vmem>>, vector<1x64x36xbf16>
    %4 = vector.shape_cast %3 : vector<1x64x36xbf16> to vector<64x36xbf16>
    %c0_3 = arith.constant 0 : index
    %c0_4 = arith.constant 0 : index
    %5 = vector.load %arg3[%c0_3, %c0_4] : memref<36x128xbf16, #tpu.memory_space<vmem>>, vector<36x128xbf16>
    %cst = arith.constant dense<0.000000e+00> : vector<64x128xf32>
    %6 = tpu.matmul %4, %5, %cst {dimension_numbers = #tpu.dot_dimension_numbers<[1], [0], [0], [1], [0, 0, 1, 1], [], []>} : vector<64x36xbf16>, vector<36x128xbf16>, vector<64x128xf32> -> vector<64x128xf32>
    %c0_5 = arith.constant 0 : index
    %c0_6 = arith.constant 0 : index
    %7 = vector.load %arg4[%c0_5, %c0_6] : memref<1x128xf32, #tpu.memory_space<vmem>>, vector<1x128xf32>
    %8 = vector.broadcast %7 : vector<1x128xf32> to vector<64x128xf32>
    %9 = arith.addf %6, %8 : vector<64x128xf32>
    %cst_7 = arith.constant 0.000000e+00 : f32
    %10 = vector.broadcast %cst_7 : f32 to vector<64x128xf32>
    %11 = arith.maximumf %9, %10 : vector<64x128xf32>
    %c0_8 = arith.constant 0 : index
    %c0_9 = arith.constant 0 : index
    %12 = vector.load %arg8[%c0_8, %c0_9] : memref<1x128xf32, #tpu.memory_space<vmem>>, vector<1x128xf32>
    %cst_10 = arith.constant dense<0.000000e+00> : vector<128xf32>
    %13 = vector.multi_reduction <add>, %11, %cst_10 [0] : vector<64x128xf32> to vector<128xf32>
    %14 = vector.shape_cast %13 : vector<128xf32> to vector<1x128xf32>
    %15 = arith.addf %12, %14 : vector<1x128xf32>
    %c0_11 = arith.constant 0 : index
    %c0_12 = arith.constant 0 : index
    %16 = vector.load %arg8[%c0_11, %c0_12] : memref<1x128xf32, #tpu.memory_space<vmem>>, vector<1x128xf32>
    tpu.vector_store %arg8[%c0_11, %c0_12], %15 {strides = array<i32>} : memref<1x128xf32, #tpu.memory_space<vmem>>, vector<1x128xf32>,
    %c3_i32 = arith.constant 3 : i32
    %17 = arith.cmpi eq, %arg1, %c3_i32 : i32
    %18 = arith.extui %17 : i1 to i32
    %c0_i32_13 = arith.constant 0 : i32
    %19 = arith.cmpi ne, %18, %c0_i32_13 : i32
    scf.if %19 {
      %c0_14 = arith.constant 0 : index
      %c0_15 = arith.constant 0 : index
      %20 = vector.load %arg8[%c0_14, %c0_15] : memref<1x128xf32, #tpu.memory_space<vmem>>, vector<1x128xf32>
      %cst_16 = arith.constant 3.906250e-03 : f32
      %21 = vector.broadcast %cst_16 : f32 to vector<1x128xf32>
      %22 = arith.mulf %20, %21 : vector<1x128xf32>
      %c0_17 = arith.constant 0 : index
      %c0_18 = arith.constant 0 : index
      %23 = vector.load %arg5[%c0_17, %c0_18] : memref<128x128xf32, #tpu.memory_space<vmem>>, vector<128x128xf32>
      %cst_19 = arith.constant dense<0.000000e+00> : vector<1x128xf32>
      %24 = tpu.matmul %22, %23, %cst_19 {dimension_numbers = #tpu.dot_dimension_numbers<[1], [0], [0], [1], [0, 0, 1, 1], [], []>} : vector<1x128xf32>, vector<128x128xf32>, vector<1x128xf32> -> vector<1x128xf32>
      %c0_20 = arith.constant 0 : index
      %c0_21 = arith.constant 0 : index
      %25 = vector.load %arg6[%c0_20, %c0_21] : memref<1x128xf32, #tpu.memory_space<vmem>>, vector<1x128xf32>
      %26 = arith.addf %24, %25 : vector<1x128xf32>
      %27 = vector.shape_cast %26 : vector<1x128xf32> to vector<1x1x128xf32>
      %c0_22 = arith.constant 0 : index
      %c0_23 = arith.constant 0 : index
      %c0_24 = arith.constant 0 : index
      %28 = vector.load %arg7[%c0_22, %c0_23, %c0_24] : memref<1x1x128xf32, #tpu.memory_space<vmem>>, vector<1x1x128xf32>
      tpu.vector_store %arg7[%c0_22, %c0_23, %c0_24], %27 {strides = array<i32>} : memref<1x1x128xf32, #tpu.memory_space<vmem>>, vector<1x1x128xf32>,
    } else {
    }
    return
  }
  func.func @transform_0(%arg0: i32, %arg1: i32) -> (i32, i32, i32) {
    %c0_i32 = arith.constant 0 : i32
    %c0_i32_0 = arith.constant 0 : i32
    return %arg0, %arg1, %c0_i32 : i32, i32, i32
  }
  func.func @transform_1(%arg0: i32, %arg1: i32) -> (i32, i32) {
    %c0_i32 = arith.constant 0 : i32
    %c0_i32_0 = arith.constant 0 : i32
    %c0_i32_1 = arith.constant 0 : i32
    return %c0_i32, %c0_i32_0 : i32, i32
  }
  func.func @transform_2(%arg0: i32, %arg1: i32) -> (i32, i32) {
    %c0_i32 = arith.constant 0 : i32
    %c0_i32_0 = arith.constant 0 : i32
    %c0_i32_1 = arith.constant 0 : i32
    return %c0_i32, %c0_i32_0 : i32, i32
  }
  func.func @transform_3(%arg0: i32, %arg1: i32) -> (i32, i32) {
    %c0_i32 = arith.constant 0 : i32
    %c0_i32_0 = arith.constant 0 : i32
    %c0_i32_1 = arith.constant 0 : i32
    return %c0_i32, %c0_i32_0 : i32, i32
  }
  func.func @transform_4(%arg0: i32, %arg1: i32) -> (i32, i32) {
    %c0_i32 = arith.constant 0 : i32
    %c0_i32_0 = arith.constant 0 : i32
    %c0_i32_1 = arith.constant 0 : i32
    return %c0_i32, %c0_i32_0 : i32, i32
  }
  func.func @transform_5(%arg0: i32, %arg1: i32) -> (i32, i32, i32) {
    %c0_i32 = arith.constant 0 : i32
    %c0_i32_0 = arith.constant 0 : i32
    %c0_i32_1 = arith.constant 0 : i32
    return %arg0, %c0_i32, %c0_i32_0 : i32, i32, i32
  }
}

</mosaic_0001>

<bundles_post_ra>
// kernel: tpu_custom_call.1
= control target key start
LH: loop header
LB: loop body
LE: loop exit
PB: predicated region body
PF: predicated region fallthrough
CT: control target
= control target key end

     0   :  { %10 = vsyncpa [#allocation4], 0  ;;  %s1108_s0 = inlined_call_operand.vmem [shape: bf16[2,256,36], index: 0, kind: input, shape index: {}]   ;;  %s1109_s1 = inlined_call_operand.vmem [shape: bf16[36,128], index: 1, kind: input, shape index: {}]   ;;  %s1110_s2 = inlined_call_operand.vmem [shape: f32[1,128], index: 2, kind: input, shape index: {}]   ;;  %s1111_s3 = inlined_call_operand.vmem [shape: f32[128,128], index: 3, kind: input, shape index: {}]   ;;  %s1112_s4 = inlined_call_operand.vmem [shape: f32[1,128], index: 4, kind: input, shape index: {}]   ;;  %s1113_s5 = inlined_call_operand.hbm [shape: f32[2,1,128], index: 5, kind: output, shape index: {}]  }
   0x1   :  { %12 = vsyncpa [#allocation4 + $0x1], 0  ;;  %s911_s18 = smov 0   ;;  %s913_s19 = smov 0  }
   0x2   :  { %s915_s20 = smov 0   ;;  %s917_s21 = smov 0  }
   0x3   :  { %s919_s22 = smov 0   ;;  %s921_s23 = smov 0  }
   0x4   :  { %s923_s24 = smov 0   ;;  %s925_s25 = smov 0  }
   0x5 LB: > { %s596_s26 = sadd.s32 4294967295, %s875_s25   ;;  %s597_s27 = sadd.s32 4294967294, %s875_s25   ;;  %s875_s25 = sphi %s925_s25, %s18_s25   ;;  %s871_s24 = sphi %s923_s24, %s1122_s24   ;;  %s867_s23 = sphi %s921_s23, %s1121_s23   ;;  %s863_s22 = sphi %s919_s22, %s1120_s22   ;;  %s859_s21 = sphi %s917_s21, %s1119_s21   ;;  %s855_s20 = sphi %s915_s20, %s1118_s20   ;;  %s851_s19 = sphi %s913_s19, %s1117_s19   ;;  %s847_s18 = sphi %s911_s18, %s1116_s18  }
   0x6   : > { %s27_s28 = sadd.s32 1, %s867_s23  ;;  %s30_s29 = sadd.s32 1, %s871_s24 }
   0x7   : > { %p28_p0 = scmp.ge.s32.totalorder %s27_s28, 4  ;;  %p159_p1 = scmp.ne.s32.totalorder %s855_s20, %s851_s19 }
   0x8   : > { %p160_p2 = scmp.eq.s32.totalorder %s596_s26, 7  ;;  %p165_p4 = scmp.ne.s32.totalorder %s851_s19, %s847_s18 }
   0x9   : > { %s1124_s28 = smov (%p28_p0, %s27_s28), 0  ;;  %s1126_s29 = smov (!%p28_p0, %s30_s29), %s871_s24 }
   0xa   : > { %p960_p3 = por %p160_p2, %p159_p1  ;;  %p32_p5 = scmp.ge.s32.totalorder %s1126_s29, 2 }
   0xb   : > { %p166_p6 = scmp.eq.s32.totalorder %s597_s27, 7  ;;  %p600_p7 = scmp.ge.s32.totalorder %s875_s25, 1 }
   0xc   : > { %p209_p8 = scmp.lt.s32.totalorder %s875_s25, 9  ;;  %s1128_s29 = smov (%p32_p5, %s1126_s29), 0 }
   0xd   : > { %p970_p9 = por %p166_p6, %p165_p4  ;;  %s146_s7 = ssub.s32 %s871_s24, %s1128_s29 }
   0xe   : > { %p210_p10 = pnand %p600_p7, %p209_p8  ;;  %s149_s8 = sadd.s32 1, %s855_s20 }
   0xf   : > { %p147_p11 = scmp.eq.s32.totalorder %s146_s7, 0  ;;  %s238_s10 = sand.u32 (!%p210_p10), 1, %s851_s19  }
  0x10   : > { %213 = sbr.rel (%p210_p10) target bundleno = 526 (0x20e), region = 40  ;;  %s601_s11 = sshll.u32 (!%p210_p10), %s859_s21, 3 }
  0x11   : > { %s978_s9 = scalar_select %p147_p11, %s855_s20, %s149_s8  }
  0x12   : > { %p241_p12 = scmp.lt.s32.totalorder (!%p210_p10), %s863_s22, 1  ;;  %p243_p13 = scmp.lt.s32.totalorder (!%p210_p10), %s601_s11, 31 }
  0x13   : > { %s989_s27 = scalar_lea.vmem (!%p210_p10), [#allocation3], %s238_s10  ;;  %p604_p0 = scmp.ne.s32.totalorder (!%p210_p10), %s859_s21, 0 }
  0x15   : > { %s242_s12 = scalar_select %p241_p12, %s863_s22, 1 }
  0x16   : > { %s1130_s11 = smov (!%p243_p13, %s601_s11), 31  ;;  %254 = sbr.rel (%p604_p0) target bundleno = 29 (0x1d), region = 44 }
  0x17   : > { %s602_s13 = sshll.u32 %s242_s12, 5 }
  0x18   : > { %s246_s14 = sadd.s32 %s602_s13, %s1130_s11 }
  0x19   : > { %s603_s15 = sshll.u32 %s246_s14, 2 }
  0x1a   : > { %s248_s26 = scalar_lea.vmem %s1108_s0, %s603_s15 }
  0x1b   : > { %v877_v0 = vmov 0.0  }
  0x1c   : > { %255 = vst [vmem:[#allocation2] sm:$0x1] %v877_v0 }
  0x1d PF: > { %v776_v1 = vld [vmem:[%s1109_s1 + $0x10] ss:$0 sps:$4 sm:$0x33]   ;;  %vm324_vm0 = vcmask 1041408   ;;  %v777_v2 = vld [vmem:[%s1109_s1 + $0x8] sm:$0xff]   ;;  %vm311_vm1 = vcmask 293888  }
  0x1e   : > { %700 = vmatprep.subr.msk.bf16.mxu0 %vm324_vm0, %v776_v1  ;;  %v326_v3 = vsel %vm324_vm0, %v776_v1, 0  ;;  %701 = vmatprep.subr.msk.bf16.mxu1 %vm324_vm0, %v776_v1  ;;  %v779_v4 = vld [vmem:[%s248_s26] sm:$0xff]   ;;  %v781_v6 = vld [vmem:[%s248_s26 + $0x10] sm:$0xff]   ;;  %v780_v7 = vld [vmem:[%s248_s26 + $0x8] sm:$0xff]   ;;  %p617_p1 = scmp.ne.s32.totalorder %s859_s21, 3 }
  0x1f   : > { %646 = vmatpush3.bf16.msra.mxu0 %v326_v3  ;;  %697 = vmatpush3.bf16.msra.mxu1 %v326_v3  ;;  %v778_v5 = vld [vmem:[%s1109_s1] sm:$0xff]   ;;  %v782_v8 = vld [vmem:[%s248_s26 + $0x18] sm:$0xff]  }
  0x20   : > { %647 = vmatprep.subr.bf16.mxu0 %v777_v2  ;;  %695 = vmatprep.subr.bf16.mxu1 %v777_v2  ;;  %v605_v13 = vld [vmem:[%s1110_s2] ss:$0 sm:$0xff] }
  0x21   : > { %651 = vmatprep.mubr.msk.bf16.mxu0 %vm311_vm1, %v779_v4  ;;  %655 = vmatprep.mubr.msk.bf16.mxu1 %vm311_vm1, %v781_v6 }
  0x23   : > { %648 = vmatpush3.bf16.msra.mxu0 %v777_v2  ;;  %698 = vmatpush3.bf16.msra.mxu1 %v777_v2  ;;  %v401_v46 = vld [vmem:[#allocation2] sm:$0x1] }
  0x24   : > { %649 = vmatprep.subr.bf16.mxu0 %v778_v5  ;;  %696 = vmatprep.subr.bf16.mxu1 %v778_v5 }
  0x27   : > { %650 = vmatpush3.bf16.msra.mxu0 %v778_v5  ;;  %699 = vmatpush3.bf16.msra.mxu1 %v778_v5 }
  0x2a   : > { %652 = vmatmul.mubr.msk.bf16.vlgmr.msra.gmra.mxu0 %vm311_vm1, %v780_v7  ;;  %656 = vmatmul.mubr.msk.bf16.vlgmr.msra.gmra.mxu1 %vm311_vm1, %v782_v8 }
  0xea   : > { %v653_v9 = vpop.f32.mrf.mxu0  ;;  %v657_v10 = vpop.f32.mrf.mxu1 }
  0xeb   : > { %v371_v18 = vadd.f32 %v653_v9, %v605_v13  ;;  %v387_v30 = vadd.f32 %v657_v10, %v605_v13 }
  0xec   : > { %v362_v11 = vpop.f32.mrf.mxu0  ;;  %v378_v12 = vpop.f32.mrf.mxu1 }
  0xed   : > { %v363_v15 = vadd.f32 %v605_v13, %v362_v11  ;;  %v395_v24 = vmax.f32 %v371_v18, 0.0  ;;  %v379_v25 = vadd.f32 %v605_v13, %v378_v12  ;;  %v399_v36 = vmax.f32 %v387_v30, 0.0 }
  0xee   : > { %v654_v14 = vpop.f32.mrf.mxu0  ;;  %v658_v17 = vpop.f32.mrf.mxu1 }
  0xef   : > { %v393_v20 = vmax.f32 %v363_v15, 0.0  ;;  %v374_v21 = vadd.f32 %v654_v14, %v605_v13  ;;  %v397_v31 = vmax.f32 %v379_v25, 0.0  ;;  %v390_v33 = vadd.f32 %v658_v17, %v605_v13 }
  0xf0   : > { %v365_v16 = vpop.f32.mrf.mxu0  ;;  %v381_v23 = vpop.f32.mrf.mxu1 }
  0xf1   : > { %v366_v19 = vadd.f32 %v605_v13, %v365_v16  ;;  %v396_v27 = vmax.f32 %v374_v21, 0.0  ;;  %v382_v29 = vadd.f32 %v605_v13, %v381_v23  ;;  %v400_v38 = vmax.f32 %v390_v33, 0.0 }
  0xf3   : > { %v394_v22 = vmax.f32 %v366_v19, 0.0  ;;  %v398_v34 = vmax.f32 %v382_v29, 0.0 }
  0xf5   : > { %v402_v26 = vadd.f32 %v394_v22, %v393_v20 }
  0xf7   : > { %v403_v28 = vadd.f32 %v402_v26, %v395_v24 }
  0xf9   : > { %v404_v32 = vadd.f32 %v403_v28, %v396_v27 }
  0xfb   : > { %v405_v35 = vadd.f32 %v404_v32, %v397_v31 }
  0xfd   : > { %v406_v37 = vadd.f32 %v405_v35, %v398_v34 }
  0xff   : > { %v407_v39 = vadd.f32 %v406_v37, %v399_v36 }
 0x101   : > { %v408_v40 = vadd.f32 %v407_v39, %v400_v38 }
 0x103   : > { %v409_v41 = vrot.slane %v408_v40, 4 }
 0x105   : > { %v410_v42 = vadd.f32 %v409_v41, %v408_v40 }
 0x107   : > { %v411_v43 = vrot.slane %v410_v42, 2 }
 0x109   : > { %v412_v44 = vadd.f32 %v411_v43, %v410_v42 }
 0x10b   : > { %v413_v45 = vrot.slane %v412_v44, 1 }
 0x10d   : > { %v414_v47 = vadd.f32 %v413_v45, %v412_v44  ;;  %420 = sbr.rel (%p617_p1) target bundleno = 503 (0x1f7), region = 48 }
 0x10f   : > { %v415_v48 = vadd.f32 %v414_v47, %v401_v46 }
 0x111   : > { %416 = vst [vmem:[#allocation2] sm:$0x1] %v415_v48 }
 0x112   : > { %v438_v49 = vld [vmem:[%s1111_s3 + $0x78] sm:$0xff]  ;;  %v878_v50 = vmov 0.0   ;;  %v437_v51 = vld [vmem:[%s1111_s3 + $0x70] sm:$0xff]  ;;  %vm879_vm2 = vmmov 0   ;;  %v436_v52 = vld [vmem:[%s1111_s3 + $0x68] sm:$0xff] }
 0x113   : > { %659 = vmatprep.subr.mxu0 %v878_v50  ;;  %691 = vmatprep.mubr.msk.f32.mxu0 %vm879_vm2, %v878_v50  ;;  %v435_v53 = vld [vmem:[%s1111_s3 + $0x60] sm:$0xff]  ;;  %v434_v54 = vld [vmem:[%s1111_s3 + $0x58] sm:$0xff]  ;;  %v433_v55 = vld [vmem:[%s1111_s3 + $0x50] sm:$0xff] }
 0x114   : > { %660 = vmatpush3.msra.mxu0 %v438_v49  ;;  %v432_v56 = vld [vmem:[%s1111_s3 + $0x48] sm:$0xff]  ;;  %v431_v57 = vld [vmem:[%s1111_s3 + $0x40] sm:$0xff]  ;;  %v430_v58 = vld [vmem:[%s1111_s3 + $0x38] sm:$0xff] }
 0x115   : > { %661 = vmatprep.subr.mxu0 %v878_v50  ;;  %v429_v59 = vld [vmem:[%s1111_s3 + $0x30] sm:$0xff]  ;;  %v428_v60 = vld [vmem:[%s1111_s3 + $0x28] sm:$0xff]  ;;  %v427_v61 = vld [vmem:[%s1111_s3 + $0x20] sm:$0xff] }
 0x116   : > { %662 = vmatpush3.msra.mxu0 %v437_v51  ;;  %v426_v62 = vld [vmem:[%s1111_s3 + $0x18] sm:$0xff]  ;;  %v425_v63 = vld [vmem:[%s1111_s3 + $0x10] sm:$0xff]  ;;  %v424_v1 = vld [vmem:[%s1111_s3 + $0x8] sm:$0xff] }
 0x117   : > { %663 = vmatprep.subr.mxu0 %v878_v50  ;;  %v423_v2 = vld [vmem:[%s1111_s3] sm:$0xff] }
 0x118   : > { %664 = vmatpush3.msra.mxu0 %v436_v52  ;;  %v421_v0 = vld [vmem:[#allocation2] sm:$0x1] }
 0x119   : > { %665 = vmatprep.subr.mxu0 %v878_v50  ;;  %v422_v3 = vmul.f32 0.00390625, %v421_v0  ;;  %v439_v4 = vld [vmem:[%s1112_s4] sm:$0x1] }
 0x11a   : > { %666 = vmatpush3.msra.mxu0 %v435_v53 }
 0x11b   : > { %667 = vmatprep.subr.mxu0 %v878_v50 }
 0x11c   : > { %668 = vmatpush3.msra.mxu0 %v434_v54 }
 0x11d   : > { %669 = vmatprep.subr.mxu0 %v878_v50 }
 0x11e   : > { %670 = vmatpush3.msra.mxu0 %v433_v55 }
 0x11f   : > { %671 = vmatprep.subr.mxu0 %v878_v50 }
 0x120   : > { %672 = vmatpush3.msra.mxu0 %v432_v56 }
 0x121   : > { %673 = vmatprep.subr.mxu0 %v878_v50 }
 0x122   : > { %674 = vmatpush3.msra.mxu0 %v431_v57 }
 0x123   : > { %675 = vmatprep.subr.mxu0 %v878_v50 }
 0x124   : > { %676 = vmatpush3.msra.mxu0 %v430_v58 }
 0x125   : > { %677 = vmatprep.subr.mxu0 %v878_v50 }
 0x126   : > { %678 = vmatpush3.msra.mxu0 %v429_v59 }
 0x127   : > { %679 = vmatprep.subr.mxu0 %v878_v50 }
 0x128   : > { %680 = vmatpush3.msra.mxu0 %v428_v60 }
 0x129   : > { %681 = vmatprep.subr.mxu0 %v878_v50 }
 0x12a   : > { %682 = vmatpush3.msra.mxu0 %v427_v61 }
 0x12b   : > { %683 = vmatprep.subr.mxu0 %v878_v50 }
 0x12c   : > { %684 = vmatpush3.msra.mxu0 %v426_v62 }
 0x12d   : > { %685 = vmatprep.subr.mxu0 %v878_v50 }
 0x12e   : > { %686 = vmatpush3.msra.mxu0 %v425_v63 }
 0x12f   : > { %687 = vmatprep.subr.mxu0 %v878_v50 }
 0x130   : > { %688 = vmatpush3.msra.mxu0 %v424_v1 }
 0x131   : > { %689 = vmatprep.subr.mxu0 %v878_v50 }
 0x132   : > { %690 = vmatpush3.msra.mxu0 %v423_v2 }
 0x133   : > { %692 = vmatmul.mubr.f32.vlgmr.msra.gmra.mxu0 %v422_v3 }
 0x1f3   : > { %v506_v5 = vpop.f32.mrf.mxu0 }
 0x1f4   : > { %v507_v6 = vadd.f32 %v506_v5, %v439_v4 }
 0x1f5   : > { %v693_v7 = vpop.f32.mrf.mxu0 }
 0x1f6   : > { %510 = vst [vmem:[%s989_s27] sm:$0x1] %v507_v6 }
 0x1f7 PF: > { %s618_s26 = sshll.u32 %s863_s22, 4  ;;  %s524_s12 = sshll.u32 %s989_s27, 4  ;;  %s525_s12 = int_to_ptr.vmem [resolvable:$true] %s524_s12 }
 0x1f8   : > { %s522_s11 = scalar_lea.hbm %s1113_s5, %s618_s26  ;;  %s512_s21 = scalar_lea.sflag [#allocation4], %s238_s10 }
 0x1f9   : > { %s783_s13 = scalar_lea.vmem %s525_s12, 16  ;;  %s880_s14 = smov [#allocation3]  }
 0x1fa   : > { %p784_p2 = scmp.ne.s32.totalorder %s525_s12, %s783_s13  ;;  %s787_s15 = sshll.u32 %s880_s14, 4  ;;  %s788_s15 = int_to_ptr.vmem [resolvable:$false] %s787_s15 }
 0x1fb   : > { %s789_s16 = scalar_lea.vmem %s788_s15, 32  ;;  %p790_p6 = scmp.lt.s32.totalorder %s525_s12, %s788_s15 }
 0x1fc   : > { %p785_p4 = pnand %p784_p2, %p960_p3  ;;  %p791_p7 = scmp.lt.s32.totalorder %s789_s16, %s783_s13 }
 0x1fe   : > { %p786_p5 = pneg %p785_p4  ;;  %p792_p8 = por %p791_p7, %p790_p6 }
 0x200   : > { %p793_p10 = pnand %p792_p8, %p786_p5 }
 0x202   : > { %796 = shalt.err (!%p793_p10)
}
 0x203   : > { %s797_s22 = scalar_lea.hbm %s522_s11, 16  ;;  %s801_s17 = scalar_lea.hbm %s1113_s5, 32 }
 0x204   : > { %p798_p11 = scmp.ne.s32.totalorder %s522_s11, %s797_s22  ;;  %p802_p0 = scmp.lt.s32.totalorder %s522_s11, %s1113_s5 }
 0x205   : > { %p803_p1 = scmp.lt.s32.totalorder %s801_s17, %s797_s22 }
 0x206   : > { %p799_p12 = pnand %p798_p11, %p960_p3 }
 0x207   : > { %p804_p2 = por %p803_p1, %p802_p0 }
 0x208   : > { %p800_p13 = pneg %p799_p12 }
 0x20a   : > { %p805_p4 = pnand %p804_p2, %p800_p13 }
 0x20c   : > { %808 = shalt.err (!%p805_p4)
}
 0x20d   : > { %702 = dma.vmem_to_hbm [thread:$0]  (%p960_p3), %s525_s12, 16, %s522_s11, %s512_s21  }
 0x20e PF: > { %p708_p5 = scmp.ge.s32.totalorder %s875_s25, 2  ;;  %s536_s8 = sand.u32 1, %s847_s18  }
 0x20f   : > { %s537_s13 = scalar_lea.sflag [#allocation4], %s536_s8 }
 0x210   : > { %p705_p6 = pnand %p708_p5, %p970_p9 }
 0x212   : > { %p706_p7 = pneg %p705_p6 }
 0x214   : > { %842 = dma.done.wait (%p706_p7), %s537_s13, 16  }
 0x215   : > { %844 = vsyncadd (%p706_p7), %s537_s13, 4294967280  ;;  %s18_s25 = sadd.s32 1, %s875_s25   ;;  %s1116_s18 = smov %s851_s19 }
 0x216   : > { %p15_p8 = scmp.ge.s32.totalorder %s18_s25, 10   ;;  %s1117_s19 = smov %s855_s20 }
 0x217   : > { %s1118_s20 = smov %s978_s9  ;;  %s1119_s21 = smov %s867_s23 }
 0x218   : > { %s1120_s22 = smov %s871_s24  ;;  %s1121_s23 = smov %s1124_s28 }
 0x219   : > { %s1122_s24 = smov %s1128_s29  ;;  %17 = sbr.rel (!%p15_p8) target bundleno = 5 (0x5), region = 83 }
 0x21e   :  { %541 = vsyncpa [#allocation4], 1 }
 0x21f   :  { %543 = vsyncpa [#allocation4 + $0x1], 1 }

</bundles_post_ra>
